<compile_context>
chip_gen: v7x
topology: tpu7x:2x2x1
jax: 0.10.0
libtpu: 0.0.40
codegen_flags: <defaults>
</compile_context>

<pallas_src>
import jax
import jax.numpy as jnp
from jax.experimental import pallas as pl
from jax.experimental.pallas import tpu as pltpu

_LANES = 128
_SUBLANES = 8
_GRANULE = _LANES * _SUBLANES  # 1024 elements = minimum (8,128) tile


def _swish_kernel(x_ref, o_ref):
    x = x_ref[...]
    # Keep bf16/f32 native (bf16 VPU/EUP on v6e/v7x); upcast anything else.
    if x.dtype not in (jnp.bfloat16, jnp.float32):
        x = x.astype(jnp.float32)
    # Swish / SiLU: x * sigmoid(x) = x / (1 + exp(-x)).
    # exp() and the approx reciprocal both run on the EUP slot, keeping the
    # VALU free; the kernel stays cleanly HBM-bound.
    denom = 1.0 + jnp.exp(-x)
    o_ref[...] = (x * pl.reciprocal(denom, approx=True)).astype(o_ref.dtype)


def swish(x, *, block_rows=1024):
    """Elementwise Swish / SiLU: x * sigmoid(x) (floating dtypes)."""
    orig_shape = x.shape
    orig_dtype = x.dtype
    n = x.size
    if n == 0:
        return x

    # Pad the flat length only up to the (8,128) granule — NOT up to a whole
    # block.  swish(0) == 0, so zero padding is numerically harmless; when n
    # is already a multiple of 1024 (common for NCHW activations) there is no
    # pad and no trailing slice at all.
    n_pad = ((n + _GRANULE - 1) // _GRANULE) * _GRANULE
    x_flat = jnp.reshape(x, (-1,))
    if n_pad != n:
        x_flat = jnp.pad(x_flat, (0, n_pad - n))
    rows = n_pad // _LANES               # always a multiple of 8

    # Clamp the tile for tiny inputs (rows is a multiple of 8, so the
    # (8,128) block constraint is always satisfied).
    block_rows = min(block_rows, rows)
    grid = (pl.cdiv(rows, block_rows),)  # ragged last block handled by Pallas

    x2d = jnp.reshape(x_flat, (rows, _LANES))
    out2d = pl.pallas_call(
        _swish_kernel,
        out_shape=jax.ShapeDtypeStruct((rows, _LANES), orig_dtype),
        grid_spec=pltpu.PrefetchScalarGridSpec(
            num_scalar_prefetch=0,
            grid=grid,
            in_specs=[pl.BlockSpec((block_rows, _LANES), lambda i: (i, 0))],
            out_specs=pl.BlockSpec((block_rows, _LANES), lambda i: (i, 0)),
        ),
        compiler_params=pltpu.CompilerParams(
            # Fully independent 1-D axis -> shards across v7x's 2 TensorCores.
            dimension_semantics=("parallel",),
        ),
    )(x2d)

    out_flat = jnp.reshape(out2d, (-1,))
    if n_pad != n:
        out_flat = out_flat[:n]
    return jnp.reshape(out_flat, orig_shape)


if __name__ == "__main__":
    key = jax.random.PRNGKey(0)
    # NCHW input, same convention the PyTorch module would see.
    x = jax.random.normal(key, (2, 4, 16, 16), dtype=jnp.float32)

    out = jax.jit(swish)(x)
    out = jax.block_until_ready(out)

    # Reference check in plain JAX (approx EUP reciprocal -> loose tolerance).
    ref = x * jax.nn.sigmoid(x)
    assert out.shape == x.shape and out.dtype == x.dtype
    assert bool(jnp.all(jnp.isfinite(out)))
    assert bool(jnp.allclose(out, ref, atol=5e-2, rtol=5e-2))

    print("KERNEL_OK")
</pallas_src>

<mosaic_0001>
module attributes {stable_mosaic.version = 11 : i64} {
  func.func @_swish_kernel(%arg0: i32, %arg1: memref<16x128xf32, #tpu.memory_space<vmem>>, %arg2: memref<16x128xf32, #tpu.memory_space<vmem>>) attributes {dimension_semantics = [#tpu.dimension_semantics<parallel>], iteration_bounds = array<i64: 1>, scalar_prefetch = 0 : i64, scratch_operands = 0 : i64, tpu.core_type = #tpu.core_type<tc>, window_params = [{transform_indices = @transform_0, window_bounds = array<i64: 16, 128>}, {transform_indices = @transform_1, window_bounds = array<i64: 16, 128>}]} {
    %c0 = arith.constant 0 : index
    %c0_0 = arith.constant 0 : index
    %0 = vector.load %arg1[%c0, %c0_0] : memref<16x128xf32, #tpu.memory_space<vmem>>, vector<16x128xf32>
    %cst = arith.constant 0.000000e+00 : f32
    %1 = vector.broadcast %cst : f32 to vector<16x128xf32>
    %2 = arith.subf %1, %0 : vector<16x128xf32>
    %3 = math.exp %2 : vector<16x128xf32>
    %cst_1 = arith.constant 1.000000e+00 : f32
    %4 = vector.broadcast %cst_1 : f32 to vector<16x128xf32>
    %5 = arith.addf %4, %3 : vector<16x128xf32>
    %6 = tpu.reciprocal %5 {approx = true} : vector<16x128xf32> -> vector<16x128xf32>
    %7 = arith.mulf %0, %6 : vector<16x128xf32>
    %c0_2 = arith.constant 0 : index
    %c0_3 = arith.constant 0 : index
    %8 = vector.load %arg2[%c0_2, %c0_3] : memref<16x128xf32, #tpu.memory_space<vmem>>, vector<16x128xf32>
    tpu.vector_store %arg2[%c0_2, %c0_3], %7 {strides = array<i32>} : memref<16x128xf32, #tpu.memory_space<vmem>>, vector<16x128xf32>,
    return
  }
  func.func @transform_0(%arg0: i32) -> (i32, i32) {
    %c0_i32 = arith.constant 0 : i32
    %c0_i32_0 = arith.constant 0 : i32
    return %arg0, %c0_i32 : i32, i32
  }
  func.func @transform_1(%arg0: i32) -> (i32, i32) {
    %c0_i32 = arith.constant 0 : i32
    %c0_i32_0 = arith.constant 0 : i32
    return %arg0, %c0_i32 : i32, i32
  }
}

</mosaic_0001>

<bundles_post_ra>
// kernel: swish.1
= control target key start
LH: loop header
LB: loop body
LE: loop exit
PB: predicated region body
PF: predicated region fallthrough
CT: control target
= control target key end

     0   :  { %s58_s0 = inlined_call_operand.vmem [shape: f32[16,128], index: 0, kind: input, shape index: {}]   ;;  %s59_s1 = inlined_call_operand.vmem [shape: f32[16,128], index: 1, kind: output, shape index: {}]  }
   0x1   :  { %v8_v0 = vld [vmem:[%s58_s0] sm:$0xff]  ;;  %v9_v1 = vld [vmem:[%s58_s0 + $0x8] sm:$0xff] }
   0x2   :  { %v10_v2 = vsub.f32 0.0, %v8_v0  ;;  %v11_v3 = vsub.f32 0.0, %v9_v1 }
   0x4   :  { %v12_v4 = vmul.f32 1.442695, %v10_v2  ;;  %v14_v5 = vmul.f32 1.442695, %v11_v3 }
   0x6   :  { %28 = vpow2.f32 %v12_v4 }
   0x7   :  { %30 = vpow2.f32 %v14_v5 }
  0x10   :  { %v29_v6 = vpop.eup %28 }
  0x11   :  { %v31_v7 = vpop.eup %30  ;;  %v16_v8 = vadd.f32 1.0, %v29_v6 }
  0x12   :  { %v17_v9 = vadd.f32 1.0, %v31_v7 }
  0x13   :  { %32 = vrcp.f32 %v16_v8 }
  0x14   :  { %34 = vrcp.f32 %v17_v9 }
  0x1d   :  { %v33_v10 = vpop.eup %32 }
  0x1e   :  { %v35_v11 = vpop.eup %34  ;;  %v20_v12 = vmul.f32 %v33_v10, %v8_v0 }
  0x1f   :  { %v21_v13 = vmul.f32 %v35_v11, %v9_v1 }
  0x20   :  { %22 = vst [vmem:[%s59_s1] sm:$0xff] %v20_v12 }
  0x21   :  { %23 = vst [vmem:[%s59_s1 + $0x8] sm:$0xff] %v21_v13 }

</bundles_post_ra>
